<compile_context>
chip_gen: v5e
topology: v5e:2x2
jax: 0.10.0
libtpu: 0.0.40
codegen_flags: <defaults>
</compile_context>

<pallas_src>
import jax
import jax.numpy as jnp
from jax import lax
from jax.experimental import pallas as pl
from jax.experimental.pallas import tpu as pltpu


def _round_up(x, m):
    return (x + m - 1) // m * m


def _pick_tile(padded_dim, candidates):
    for c in candidates:
        if padded_dim % c == 0:
            return c
    return padded_dim


def _fc_kernel(x_ref, w_ref, b_ref, o_ref, acc_ref):
    # x_ref: [tm, tk], w_ref: [tn, tk] (PyTorch [N, K] layout), b_ref: [1, tn]
    k = pl.program_id(2)

    @pl.when(k == 0)
    def _():
        acc_ref[...] = jnp.zeros_like(acc_ref)

    # Contract over K (last axis of both operands) -> [tm, tn] on the MXU.
    acc_ref[...] += lax.dot_general(
        x_ref[...], w_ref[...],
        dimension_numbers=(((1,), (1,)), ((), ())),
        preferred_element_type=jnp.float32,
    )

    @pl.when(k == pl.num_programs(2) - 1)
    def _():
        o_ref[...] = (acc_ref[...] + b_ref[...]).astype(o_ref.dtype)


def fc_forward(x_nchw, weight, bias):
    """x_nchw: [B, C, H, W]; weight: [N, K] (PyTorch layout); bias: [N]."""
    B = x_nchw.shape[0]
    K = x_nchw.shape[1] * x_nchw.shape[2] * x_nchw.shape[3]
    N = weight.shape[0]

    x2d = x_nchw.reshape(B, K)          # torch.flatten(x, 1)
    b2d = bias.reshape(1, N)

    # Pad to TPU-friendly sizes (sublane 8 for B, lane 128 for K/N).
    B_pad = _round_up(B, 8)
    K_pad = _round_up(K, 128)
    N_pad = _round_up(N, 128)

    if (B_pad, K_pad) != (B, K):
        x2d = jnp.pad(x2d, ((0, B_pad - B), (0, K_pad - K)))
    if (N_pad, K_pad) != (N, K):
        weight = jnp.pad(weight, ((0, N_pad - N), (0, K_pad - K)))
    if N_pad != N:
        b2d = jnp.pad(b2d, ((0, 0), (0, N_pad - N)))

    # Tile sizes: lane-dense output, bounded VMEM (safe on v7x's 64 MiB).
    tm = B_pad if B_pad <= 256 else _pick_tile(B_pad, (256, 128, 64, 32, 16, 8))
    tn = _pick_tile(N_pad, (256, 128))
    tk = _pick_tile(K_pad, (512, 384, 256, 128))

    grid = (B_pad // tm, N_pad // tn, K_pad // tk)

    out_padded = pl.pallas_call(
        _fc_kernel,
        out_shape=jax.ShapeDtypeStruct((B_pad, N_pad), x2d.dtype),
        grid_spec=pltpu.PrefetchScalarGridSpec(
            num_scalar_prefetch=0,
            grid=grid,
            in_specs=[
                pl.BlockSpec((tm, tk), lambda m, n, k: (m, k)),   # x  [B, K]
                pl.BlockSpec((tn, tk), lambda m, n, k: (n, k)),   # W  [N, K]
                pl.BlockSpec((1, tn), lambda m, n, k: (0, n)),    # b  [1, N]
            ],
            out_specs=pl.BlockSpec((tm, tn), lambda m, n, k: (m, n)),
            scratch_shapes=[pltpu.VMEM((tm, tn), jnp.float32)],
        ),
        compiler_params=pltpu.CompilerParams(
            dimension_semantics=("parallel", "parallel", "arbitrary"),
        ),
    )(x2d, weight, b2d)

    return out_padded[:B, :N]


if __name__ == "__main__":
    # Small shapes consistent with the module's forward.
    B, C, H, W = 2, 3, 16, 16          # input_size=16, input_channels=3
    num_classes = 10
    K = C * H * W                      # 768

    key = jax.random.PRNGKey(0)
    kx, kw, kb = jax.random.split(key, 3)

    x = jax.random.normal(kx, (B, C, H, W), dtype=jnp.float32)

    # Deterministic Linear init (PyTorch default: U(-1/sqrt(K), 1/sqrt(K))).
    bound = 1.0 / jnp.sqrt(jnp.float32(K))
    weight = jax.random.uniform(kw, (num_classes, K), jnp.float32, -bound, bound)
    bias = jax.random.uniform(kb, (num_classes,), jnp.float32, -bound, bound)

    y = fc_forward(x, weight, bias)
    jax.block_until_ready(y)

    # Sanity check against plain-JAX reference.
    y_ref = x.reshape(B, K) @ weight.T + bias
    assert y.shape == (B, num_classes)
    assert jnp.allclose(y, y_ref, atol=1e-4, rtol=1e-4)

    print("KERNEL_OK")
</pallas_src>

<mosaic_0001>
module attributes {stable_mosaic.version = 11 : i64} {
  func.func @_fc_kernel(%arg0: i32, %arg1: i32, %arg2: i32, %arg3: memref<8x384xf32, #tpu.memory_space<vmem>>, %arg4: memref<128x384xf32, #tpu.memory_space<vmem>>, %arg5: memref<1x128xf32, #tpu.memory_space<vmem>>, %arg6: memref<8x128xf32, #tpu.memory_space<vmem>>, %arg7: memref<8x128xf32, #tpu.memory_space<vmem>>) attributes {dimension_semantics = [#tpu.dimension_semantics<parallel>, #tpu.dimension_semantics<parallel>, #tpu.dimension_semantics<arbitrary>], iteration_bounds = array<i64: 1, 1, 2>, scalar_prefetch = 0 : i64, scratch_operands = 1 : i64, tpu.core_type = #tpu.core_type<tc>, window_params = [{transform_indices = @transform_0, window_bounds = array<i64: 8, 384>}, {transform_indices = @transform_1, window_bounds = array<i64: 128, 384>}, {transform_indices = @transform_2, window_bounds = array<i64: 1, 128>}, {transform_indices = @transform_3, window_bounds = array<i64: 8, 128>}]} {
    %c0_i32 = arith.constant 0 : i32
    %0 = arith.cmpi eq, %arg2, %c0_i32 : i32
    %1 = arith.extui %0 : i1 to i32
    %c0_i32_0 = arith.constant 0 : i32
    %2 = arith.cmpi ne, %1, %c0_i32_0 : i32
    scf.if %2 {
      %cst_9 = arith.constant 0.000000e+00 : f32
      %12 = vector.broadcast %cst_9 : f32 to vector<8x128xf32>
      %c0_10 = arith.constant 0 : index
      %c0_11 = arith.constant 0 : index
      %13 = vector.load %arg7[%c0_10, %c0_11] : memref<8x128xf32, #tpu.memory_space<vmem>>, vector<8x128xf32>
      tpu.vector_store %arg7[%c0_10, %c0_11], %12 {strides = array<i32>} : memref<8x128xf32, #tpu.memory_space<vmem>>, vector<8x128xf32>,
    } else {
    }
    %c0 = arith.constant 0 : index
    %c0_1 = arith.constant 0 : index
    %3 = vector.load %arg7[%c0, %c0_1] : memref<8x128xf32, #tpu.memory_space<vmem>>, vector<8x128xf32>
    %c0_2 = arith.constant 0 : index
    %c0_3 = arith.constant 0 : index
    %4 = vector.load %arg3[%c0_2, %c0_3] : memref<8x384xf32, #tpu.memory_space<vmem>>, vector<8x384xf32>
    %c0_4 = arith.constant 0 : index
    %c0_5 = arith.constant 0 : index
    %5 = vector.load %arg4[%c0_4, %c0_5] : memref<128x384xf32, #tpu.memory_space<vmem>>, vector<128x384xf32>
    %cst = arith.constant dense<0.000000e+00> : vector<8x128xf32>
    %6 = tpu.matmul %4, %5, %cst {dimension_numbers = #tpu.dot_dimension_numbers<[1], [1], [0], [0], [0, 0, 1, 0], [], []>} : vector<8x384xf32>, vector<128x384xf32>, vector<8x128xf32> -> vector<8x128xf32>
    %7 = arith.addf %3, %6 : vector<8x128xf32>
    %c0_6 = arith.constant 0 : index
    %c0_7 = arith.constant 0 : index
    %8 = vector.load %arg7[%c0_6, %c0_7] : memref<8x128xf32, #tpu.memory_space<vmem>>, vector<8x128xf32>
    tpu.vector_store %arg7[%c0_6, %c0_7], %7 {strides = array<i32>} : memref<8x128xf32, #tpu.memory_space<vmem>>, vector<8x128xf32>,
    %c1_i32 = arith.constant 1 : i32
    %9 = arith.cmpi eq, %arg2, %c1_i32 : i32
    %10 = arith.extui %9 : i1 to i32
    %c0_i32_8 = arith.constant 0 : i32
    %11 = arith.cmpi ne, %10, %c0_i32_8 : i32
    scf.if %11 {
      %c0_9 = arith.constant 0 : index
      %c0_10 = arith.constant 0 : index
      %12 = vector.load %arg7[%c0_9, %c0_10] : memref<8x128xf32, #tpu.memory_space<vmem>>, vector<8x128xf32>
      %c0_11 = arith.constant 0 : index
      %c0_12 = arith.constant 0 : index
      %13 = vector.load %arg5[%c0_11, %c0_12] : memref<1x128xf32, #tpu.memory_space<vmem>>, vector<1x128xf32>
      %14 = vector.broadcast %13 : vector<1x128xf32> to vector<8x128xf32>
      %15 = arith.addf %12, %14 : vector<8x128xf32>
      %c0_13 = arith.constant 0 : index
      %c0_14 = arith.constant 0 : index
      %16 = vector.load %arg6[%c0_13, %c0_14] : memref<8x128xf32, #tpu.memory_space<vmem>>, vector<8x128xf32>
      tpu.vector_store %arg6[%c0_13, %c0_14], %15 {strides = array<i32>} : memref<8x128xf32, #tpu.memory_space<vmem>>, vector<8x128xf32>,
    } else {
    }
    return
  }
  func.func @transform_0(%arg0: i32, %arg1: i32, %arg2: i32) -> (i32, i32) {
    %c0_i32 = arith.constant 0 : i32
    return %arg0, %arg2 : i32, i32
  }
  func.func @transform_1(%arg0: i32, %arg1: i32, %arg2: i32) -> (i32, i32) {
    %c0_i32 = arith.constant 0 : i32
    return %arg1, %arg2 : i32, i32
  }
  func.func @transform_2(%arg0: i32, %arg1: i32, %arg2: i32) -> (i32, i32) {
    %c0_i32 = arith.constant 0 : i32
    %c0_i32_0 = arith.constant 0 : i32
    return %c0_i32, %arg1 : i32, i32
  }
  func.func @transform_3(%arg0: i32, %arg1: i32, %arg2: i32) -> (i32, i32) {
    %c0_i32 = arith.constant 0 : i32
    return %arg0, %arg1 : i32, i32
  }
}

</mosaic_0001>

<bundles_post_ra>
// kernel: tpu_custom_call.1
= control target key start
LH: loop header
LB: loop body
LE: loop exit
PB: predicated region body
PF: predicated region fallthrough
CT: control target
= control target key end

     0   :  { %8 = vsyncpa [#allocation4], 0  ;;  %s948_s0 = inlined_call_operand.hbm [shape: f32[8,768], index: 0, kind: input, shape index: {}]   ;;  %s949_s1 = inlined_call_operand.hbm [shape: f32[128,768], index: 1, kind: input, shape index: {}]   ;;  %s950_s2 = inlined_call_operand.vmem [shape: f32[1,128], index: 2, kind: input, shape index: {}]   ;;  %s951_s3 = inlined_call_operand.hbm [shape: f32[8,128], index: 3, kind: output, shape index: {}]  }
   0x1   :  { %10 = vsyncpa [#allocation4 + $0x1], 0 }
   0x2   :  { %11 = vsyncpa [#allocation7], 0 }
   0x3   :  { %13 = vsyncpa [#allocation7 + $0x1], 0 }
   0x4   :  { %14 = vsyncpa [#allocation5], 0  ;;  %s783_s12 = smov 0   ;;  %s785_s13 = smov 0  }
   0x5   :  { %s787_s14 = smov 0   ;;  %s789_s15 = smov 0  }
   0x6   :  { %s791_s16 = smov 0   ;;  %s793_s17 = smov 0  }
   0x7 LB: > { %s519_s18 = sadd.s32 4294967295, %s756_s17   ;;  %s32_s19 = sadd.s32 1, %s752_s16  ;;  %s756_s17 = sphi %s793_s17, %s20_s17   ;;  %s752_s16 = sphi %s791_s16, %s958_s16   ;;  %s748_s15 = sphi %s789_s15, %s957_s15   ;;  %s744_s14 = sphi %s787_s14, %s956_s14   ;;  %s740_s13 = sphi %s785_s13, %s955_s13   ;;  %s736_s12 = sphi %s783_s12, %s954_s12  }
   0x8   : > { %p33_p0 = scmp.ge.s32.totalorder %s32_s19, 2  ;;  %s48_s20 = sadd.s32 1, %s744_s14 }
   0x9   : > { %p55_p1 = scmp.ne.s32.totalorder %s744_s14, %s740_s13  ;;  %p56_p2 = scmp.eq.s32.totalorder %s756_s17, 0 }
   0xa   : > { %s960_s19 = smov (%p33_p0, %s32_s19), 0  ;;  %p61_p4 = scmp.ne.s32.totalorder %s740_s13, %s736_s12 }
   0xb   : > { %p57_p3 = por %p56_p2, %p55_p1  ;;  %s44_s21 = ssub.s32 %s752_s16, %s960_s19 }
   0xc   : > { %p62_p5 = scmp.eq.s32.totalorder %s519_s18, 0  ;;  %p46_p6 = scmp.eq.s32.totalorder %s44_s21, 0 }
   0xd   : > { %p553_p8 = scmp.lt.s32.totalorder %s756_s17, 2  ;;  %s833_s24 = sand.u32 1, %s744_s14  }
   0xe   : > { %p824_p7 = por %p62_p5, %p61_p4  ;;  %s532_s25 = smul.u32 24, %s752_s16 }
   0xf   : > { %s830_s23 = scalar_select %p46_p6, %s744_s14, %s48_s20  }
  0x10   : > { %s534_s26 = smul.u32 24, %s833_s24  ;;  %s184_s29 = scalar_lea.hbm %s948_s0, %s532_s25 }
  0x11   : > { %p840_p9 = pnand %p553_p8, %p57_p3  ;;  %s186_s4 = sshll.u32 %s184_s29, 4  ;;  %s187_s4 = int_to_ptr.hbm [resolvable:$true] %s186_s4 }
  0x12   : > { %s177_s5 = scalar_lea.vmem [#allocation3], %s534_s26  ;;  %s174_s7 = scalar_lea.sflag [#allocation4], %s833_s24 }
  0x13   : > { %s188_s6 = sshll.u32 %s177_s5, 4  ;;  %s535_s8 = smul.u32 384, %s833_s24  ;;  %s189_s6 = int_to_ptr.vmem [resolvable:$true] %s188_s6 }
  0x14   : > { %549 = dma.hbm_to_vmem [thread:$0]  (!%p840_p9), %s187_s4, 384, %s189_s6, %s174_s7  }
  0x15   : > { %s207_s11 = scalar_lea.hbm %s949_s1, %s532_s25  ;;  %p525_p10 = scmp.ge.s32.totalorder %s756_s17, 1 }
  0x16   : > { %s208_s12 = sshll.u32 %s207_s11, 4  ;;  %p218_p11 = scmp.lt.s32.totalorder %s756_s17, 3  ;;  %s209_s12 = int_to_ptr.hbm [resolvable:$true] %s208_s12 }
  0x17   : > { %s199_s20 = scalar_lea.vmem [#allocation6], %s535_s8  ;;  %s196_s26 = scalar_lea.sflag [#allocation7], %s833_s24 }
  0x18   : > { %s210_s21 = sshll.u32 %s199_s20, 4  ;;  %p219_p12 = pnand %p525_p10, %p218_p11  ;;  %s211_s21 = int_to_ptr.vmem [resolvable:$true] %s210_s21 }
  0x19   : > { %s758_s27 = smov 768   ;;  %s759_s28 = smov 384  }
  0x1a   : > { %s760_s29 = smov 24   ;;  %222 = sbr.rel (%p219_p12) target bundleno = 263 (0x107), region = 32 }
  0x1b   : > { %552 = dma.hbm_to_vmem [thread:$0]  (!%p840_p9), %s209_s12, 6144, %s211_s21, %s196_s26, %s758_s27, %s759_s28, %s760_s29  }
  0x1c   : > { %s224_s4 = sand.u32 (!%p219_p12), 1, %s740_s13  }
  0x1d   : > { %s536_s5 = smul.u32 (!%p219_p12), 24, %s224_s4  ;;  %s225_s25 = scalar_lea.sflag (!%p219_p12), [#allocation4], %s224_s4 }
  0x1f   : > { %s857_s6 = scalar_lea.vmem [#allocation3], %s536_s5 }
  0x20   : > { %723 = dma.done.wait (%p824_p7), %s225_s25, 384  }
  0x21   : > { %725 = vsyncadd (%p824_p7), %s225_s25, 4294966912  ;;  %s537_s24 = smul.u32 384, %s224_s4  ;;  %s235_s7 = scalar_lea.sflag [#allocation7], %s224_s4 }
  0x23   : > { %s863_s8 = scalar_lea.vmem [#allocation6], %s537_s24 }
  0x24   : > { %727 = dma.done.wait (%p824_p7), %s235_s7, 6144  }
  0x25   : > { %729 = vsyncadd (%p824_p7), %s235_s7, 4294961152  ;;  %p526_p13 = scmp.ne.s32.totalorder %s748_s15, 0 }
  0x27   : > { %274 = sbr.rel (%p526_p13) target bundleno = 46 (0x2e), region = 44 }
  0x2c   : > { %v761_v0 = vmov 0.0  }
  0x2d   : > { %275 = vst [vmem:[#allocation2] sm:$0xff] %v761_v0 }
  0x2e PF: > { %v327_v1 = vld [vmem:[%s863_s8 + $0x178] sm:$0xff]  ;;  %v325_v2 = vld [vmem:[%s863_s8 + $0x168] sm:$0xff]  ;;  %v326_v3 = vld [vmem:[%s863_s8 + $0x170] sm:$0xff]  ;;  %p527_p0 = scmp.ne.s32.totalorder %s748_s15, 1 }
  0x2f   : > { %368 = vmatpush.xpose.msra.mxu2 %v327_v1  ;;  %328 = vmatpush.xpose.msra.mxu0 %v325_v2  ;;  %v324_v4 = vld [vmem:[%s863_s8 + $0x160] sm:$0xff]  ;;  %v322_v5 = vld [vmem:[%s863_s8 + $0x150] sm:$0xff]  ;;  %v323_v6 = vld [vmem:[%s863_s8 + $0x158] sm:$0xff] }
  0x30   : > { %348 = vmatpush.xpose.msra.mxu1 %v326_v3  ;;  %v321_v7 = vld [vmem:[%s863_s8 + $0x148] sm:$0xff]  ;;  %v319_v8 = vld [vmem:[%s863_s8 + $0x138] sm:$0xff]  ;;  %v320_v9 = vld [vmem:[%s863_s8 + $0x140] sm:$0xff] }
  0x31   : > { %v318_v10 = vld [vmem:[%s863_s8 + $0x130] sm:$0xff]  ;;  %v316_v11 = vld [vmem:[%s863_s8 + $0x120] sm:$0xff]  ;;  %v317_v12 = vld [vmem:[%s863_s8 + $0x128] sm:$0xff] }
  0x32   : > { %v315_v13 = vld [vmem:[%s863_s8 + $0x118] sm:$0xff]  ;;  %v313_v14 = vld [vmem:[%s863_s8 + $0x108] sm:$0xff]  ;;  %v314_v15 = vld [vmem:[%s863_s8 + $0x110] sm:$0xff] }
  0x33   : > { %369 = vmatpush.xpose.msra.mxu2 %v324_v4  ;;  %329 = vmatpush.xpose.msra.mxu0 %v322_v5  ;;  %v312_v16 = vld [vmem:[%s863_s8 + $0x100] sm:$0xff]  ;;  %v310_v17 = vld [vmem:[%s863_s8 + $0xf0] sm:$0xff]  ;;  %v311_v18 = vld [vmem:[%s863_s8 + $0xf8] sm:$0xff] }
  0x34   : > { %349 = vmatpush.xpose.msra.mxu1 %v323_v6  ;;  %v309_v19 = vld [vmem:[%s863_s8 + $0xe8] sm:$0xff]  ;;  %v307_v20 = vld [vmem:[%s863_s8 + $0xd8] sm:$0xff]  ;;  %v308_v21 = vld [vmem:[%s863_s8 + $0xe0] sm:$0xff] }
  0x35   : > { %v306_v22 = vld [vmem:[%s863_s8 + $0xd0] sm:$0xff]  ;;  %v304_v23 = vld [vmem:[%s863_s8 + $0xc0] sm:$0xff]  ;;  %v305_v24 = vld [vmem:[%s863_s8 + $0xc8] sm:$0xff] }
  0x36   : > { %v303_v25 = vld [vmem:[%s863_s8 + $0xb8] sm:$0xff]  ;;  %v301_v26 = vld [vmem:[%s863_s8 + $0xa8] sm:$0xff]  ;;  %v302_v27 = vld [vmem:[%s863_s8 + $0xb0] sm:$0xff] }
  0x37   : > { %370 = vmatpush.xpose.msra.mxu2 %v321_v7  ;;  %330 = vmatpush.xpose.msra.mxu0 %v319_v8  ;;  %v300_v28 = vld [vmem:[%s863_s8 + $0xa0] sm:$0xff]  ;;  %v298_v29 = vld [vmem:[%s863_s8 + $0x90] sm:$0xff]  ;;  %v299_v30 = vld [vmem:[%s863_s8 + $0x98] sm:$0xff] }
  0x38   : > { %350 = vmatpush.xpose.msra.mxu1 %v320_v9  ;;  %v297_v31 = vld [vmem:[%s863_s8 + $0x88] sm:$0xff]  ;;  %v295_v32 = vld [vmem:[%s863_s8 + $0x78] sm:$0xff]  ;;  %v296_v33 = vld [vmem:[%s863_s8 + $0x80] sm:$0xff] }
  0x39   : > { %v294_v34 = vld [vmem:[%s863_s8 + $0x70] sm:$0xff]  ;;  %v292_v35 = vld [vmem:[%s863_s8 + $0x60] sm:$0xff]  ;;  %v293_v36 = vld [vmem:[%s863_s8 + $0x68] sm:$0xff] }
  0x3a   : > { %v291_v37 = vld [vmem:[%s863_s8 + $0x58] sm:$0xff]  ;;  %v289_v38 = vld [vmem:[%s863_s8 + $0x48] sm:$0xff]  ;;  %v290_v39 = vld [vmem:[%s863_s8 + $0x50] sm:$0xff] }
  0x3b   : > { %371 = vmatpush.xpose.msra.mxu2 %v318_v10  ;;  %331 = vmatpush.xpose.msra.mxu0 %v316_v11  ;;  %v288_v40 = vld [vmem:[%s863_s8 + $0x40] sm:$0xff]  ;;  %v286_v41 = vld [vmem:[%s863_s8 + $0x30] sm:$0xff]  ;;  %v287_v42 = vld [vmem:[%s863_s8 + $0x38] sm:$0xff] }
  0x3c   : > { %351 = vmatpush.xpose.msra.mxu1 %v317_v12  ;;  %v285_v43 = vld [vmem:[%s863_s8 + $0x28] sm:$0xff]  ;;  %v283_v44 = vld [vmem:[%s863_s8 + $0x18] sm:$0xff]  ;;  %v284_v45 = vld [vmem:[%s863_s8 + $0x20] sm:$0xff] }
  0x3d   : > { %v282_v46 = vld [vmem:[%s863_s8 + $0x10] sm:$0xff]  ;;  %v280_v47 = vld [vmem:[%s863_s8] sm:$0xff]  ;;  %v281_v48 = vld [vmem:[%s863_s8 + $0x8] sm:$0xff] }
  0x3e   : > { %v279_v49 = vld [vmem:[%s857_s6 + $0x10] sm:$0xff]  ;;  %v277_v50 = vld [vmem:[%s857_s6] sm:$0xff]  ;;  %v278_v51 = vld [vmem:[%s857_s6 + $0x8] sm:$0xff] }
  0x3f   : > { %372 = vmatpush.xpose.msra.mxu2 %v315_v13  ;;  %332 = vmatpush.xpose.msra.mxu0 %v313_v14  ;;  %v276_v55 = vld [vmem:[#allocation2] sm:$0xff] }
  0x40   : > { %352 = vmatpush.xpose.msra.mxu1 %v314_v15 }
  0x43   : > { %373 = vmatpush.xpose.msra.mxu2 %v312_v16  ;;  %333 = vmatpush.xpose.msra.mxu0 %v310_v17 }
  0x44   : > { %353 = vmatpush.xpose.msra.mxu1 %v311_v18 }
  0x47   : > { %374 = vmatpush.xpose.msra.mxu2 %v309_v19  ;;  %334 = vmatpush.xpose.msra.mxu0 %v307_v20 }
  0x48   : > { %354 = vmatpush.xpose.msra.mxu1 %v308_v21 }
  0x4b   : > { %375 = vmatpush.xpose.msra.mxu2 %v306_v22  ;;  %335 = vmatpush.xpose.msra.mxu0 %v304_v23 }
  0x4c   : > { %355 = vmatpush.xpose.msra.mxu1 %v305_v24 }
  0x4f   : > { %376 = vmatpush.xpose.msra.mxu2 %v303_v25  ;;  %336 = vmatpush.xpose.msra.mxu0 %v301_v26 }
  0x50   : > { %356 = vmatpush.xpose.msra.mxu1 %v302_v27 }
  0x53   : > { %377 = vmatpush.xpose.msra.mxu2 %v300_v28  ;;  %337 = vmatpush.xpose.msra.mxu0 %v298_v29 }
  0x54   : > { %357 = vmatpush.xpose.msra.mxu1 %v299_v30 }
  0x57   : > { %378 = vmatpush.xpose.msra.mxu2 %v297_v31  ;;  %338 = vmatpush.xpose.msra.mxu0 %v295_v32 }
  0x58   : > { %358 = vmatpush.xpose.msra.mxu1 %v296_v33 }
  0x5b   : > { %379 = vmatpush.xpose.msra.mxu2 %v294_v34  ;;  %339 = vmatpush.xpose.msra.mxu0 %v292_v35 }
  0x5c   : > { %359 = vmatpush.xpose.msra.mxu1 %v293_v36 }
  0x5f   : > { %380 = vmatpush.xpose.msra.mxu2 %v291_v37  ;;  %340 = vmatpush.xpose.msra.mxu0 %v289_v38 }
  0x60   : > { %360 = vmatpush.xpose.msra.mxu1 %v290_v39 }
  0x63   : > { %381 = vmatpush.xpose.msra.mxu2 %v288_v40  ;;  %341 = vmatpush.xpose.msra.mxu0 %v286_v41 }
  0x64   : > { %361 = vmatpush.xpose.msra.mxu1 %v287_v42 }
  0x67   : > { %382 = vmatpush.xpose.msra.mxu2 %v285_v43  ;;  %342 = vmatpush.xpose.msra.mxu0 %v283_v44 }
  0x68   : > { %362 = vmatpush.xpose.msra.mxu1 %v284_v45 }
  0x6b   : > { %383 = vmatpush.xpose.msra.mxu2 %v282_v46  ;;  %343 = vmatpush.xpose.msra.mxu0 %v280_v47 }
  0x6c   : > { %363 = vmatpush.xpose.msra.mxu1 %v281_v48 }
  0x6e   : > { %384 = vmatmul.f32.vlgmr.msra.gmra.mxu2 %v279_v49  ;;  %344 = vmatmul.f32.vlgmr.msra.gmra.mxu0 %v277_v50 }
  0x6f   : > { %364 = vmatmul.f32.vlgmr.msra.gmra.mxu1 %v278_v51 }
  0xeb   : > { %v345_v52 = vpop.f32.mrf.mxu0 }
  0xec   : > { %v365_v53 = vpop.f32.mrf.mxu1 }
  0xed   : > { %v366_v54 = vadd.f32 %v365_v53, %v345_v52 }
  0xf1   : > { %v385_v56 = vpop.f32.mrf.mxu2 }
  0xf2   : > { %v386_v57 = vadd.f32 %v385_v56, %v366_v54  ;;  %393 = sbr.rel (%p527_p0) target bundleno = 257 (0x101), region = 48 }
  0xf4   : > { %v388_v58 = vadd.f32 %v386_v57, %v276_v55 }
  0xf6   : > { %389 = vst [vmem:[#allocation2] sm:$0xff] %v388_v58 }
  0xf7   : > { %v609_v60 = vld [vmem:[%s950_s2] ss:$0 sm:$0xff] }
  0xfd   : > { %v394_v59 = vld [vmem:[#allocation2] sm:$0xff] }
  0xfe   : > { %v399_v61 = vadd.f32 %v609_v60, %v394_v59 }
 0x100   : > { %400 = vst [vmem:[#allocation8] sm:$0xff] %v399_v61 }
 0x101 PF: > { %p554_p1 = scmp.eq.s32.totalorder %s519_s18, 1  ;;  %s412_s11 = sshll.u32 %s951_s3, 4  ;;  %s413_s11 = int_to_ptr.hbm [resolvable:$true] %s412_s11 }
 0x102   : > { %s762_s12 = smov [#allocation8]  }
 0x103   : > { %s410_s20 = sshll.u32 %s762_s12, 4  ;;  %s411_s20 = int_to_ptr.vmem [resolvable:$true] %s410_s20 }
 0x104   : > { %543 = dma.vmem_to_hbm [thread:$0]  (%p554_p1), %s411_s20, 128, %s413_s11, [#allocation5]  }
 0x105   : > { %731 = dma.done.wait (%p554_p1), [#allocation5], 128  }
 0x106   : > { %733 = vsyncadd (%p554_p1), [#allocation5], 4294967168 }
 0x107 PF: > { %s20_s17 = sadd.s32 1, %s756_s17   ;;  %s954_s12 = smov %s740_s13 }
 0x108   : > { %p17_p2 = scmp.ge.s32.totalorder %s20_s17, 4   ;;  %s955_s13 = smov %s744_s14 }
 0x109   : > { %s956_s14 = smov %s830_s23  ;;  %s957_s15 = smov %s752_s16 }
 0x10a   : > { %s958_s16 = smov %s960_s19  ;;  %19 = sbr.rel (!%p17_p2) target bundleno = 7 (0x7), region = 94 }
 0x10f   :  { %426 = vsyncpa [#allocation4], 1 }
 0x110   :  { %428 = vsyncpa [#allocation4 + $0x1], 1 }
 0x111   :  { %429 = vsyncpa [#allocation7], 1 }
 0x112   :  { %431 = vsyncpa [#allocation7 + $0x1], 1 }
 0x113   :  { %432 = vsyncpa [#allocation5], 1 }
 0x114   :  { %434 = vsyncpa [#allocation5 + $0x1], 1 }

</bundles_post_ra>
